<compile_context>
chip_gen: v7x
topology: tpu7x:2x2x1
jax: 0.10.0
libtpu: 0.0.40
codegen_flags: <defaults>
</compile_context>

<pallas_src>
import functools

import jax
import jax.numpy as jnp
from jax import lax
from jax.experimental import pallas as pl
from jax.experimental.pallas import tpu as pltpu


def _round_up(x: int, m: int) -> int:
    return ((x + m - 1) // m) * m


def _hd_loss_kernel(pred_ref, gt_t_ref, g_sq_ref, out_ref, lhs_ref, min_ref, *,
                    n_true, tn, num_lane_groups):
    n = pl.program_id(0)            # prediction-tile index ("parallel")
    m = pl.program_id(1)            # ground-truth-tile index ("arbitrary" / reduction)
    num_m = pl.num_programs(1)

    # Hoist the M-loop-invariant prediction work (f32 cast, -2 scale, matmul
    # dtype cast) into a per-N-tile scratch: computed once, reused for m > 0.
    @pl.when(m == 0)
    def _():
        p0 = pred_ref[...].astype(jnp.float32)
        lhs_ref[...] = (p0 * (-2.0)).astype(lhs_ref.dtype)

    # cross_ij = -2 p_i . g_j on the MXU; RHS is already (K=D, N=TM), so the GT
    # tile is lane-dense and needs no per-step relayout.
    cross = lax.dot_general(lhs_ref[...], gt_t_ref[...],
                            (((1,), (0,)), ((), ())),
                            preferred_element_type=jnp.float32)        # (TN, TM) f32

    g_sq = g_sq_ref[...]            # (1, TM) f32; +inf on padded GT columns

    # Fold (TN, TM) -> (TN, 128) with static 128-lane-group slices.  Aligned
    # 128-column slices of an f32 tile are whole vregs -> pure VPU, no XLU.
    folded = cross[:, 0:128] + g_sq[:, 0:128]
    for k in range(1, num_lane_groups):
        lo, hi = k * 128, (k + 1) * 128
        folded = jnp.minimum(folded, cross[:, lo:hi] + g_sq[:, lo:hi])

    # Running elementwise min across M tiles on the small (TN, 128) scratch.
    @pl.when(m == 0)
    def _():
        min_ref[...] = folded

    @pl.when(m > 0)
    def _():
        min_ref[...] = jnp.minimum(min_ref[...], folded)

    # Finalize once per N tile: one cross-lane reduce, add ||p||^2 on a (TN, 1)
    # vector, clamp fp error, mask padded prediction rows, take the tile max.
    @pl.when(m == num_m - 1)
    def _():
        row_min = jnp.min(min_ref[...], axis=1, keepdims=True)         # (TN, 1)
        p = pred_ref[...].astype(jnp.float32)
        p_sq = jnp.sum(p * p, axis=1, keepdims=True)                   # (TN, 1)
        d2 = jnp.maximum(row_min + p_sq, 0.0)                          # clamp fp error
        if n_true % tn != 0:
            row_id = n * tn + lax.broadcasted_iota(jnp.int32, d2.shape, 0)
            d2 = jnp.where(row_id < n_true, d2, -jnp.inf)
        tile_max = jnp.max(d2)                                         # squared; sqrt deferred
        out_ref[...] = jnp.broadcast_to(tile_max, out_ref.shape).astype(out_ref.dtype)


def hd_loss(prediction: jax.Array, ground_truth: jax.Array, *,
            tile_n: int = 256, tile_m: int = 1024,
            use_bf16_matmul: bool = True) -> jax.Array:
    """Pallas implementation of HDLoss.forward for 2-D inputs (N, D), (M, D).

    use_bf16_matmul=True runs only the -2 p.g cross term in bf16 (halves MXU
    passes and GT DMA bytes); ||p||^2 / ||g||^2 and the accumulation stay f32.
    Set False for closest agreement with torch.cdist.
    """
    assert prediction.ndim == 2 and ground_truth.ndim == 2
    assert prediction.shape[1] == ground_truth.shape[1]
    # TODO(synk): support batched (B, N, D) inputs with an extra leading "parallel" grid axis.

    n, d = prediction.shape
    m, _ = ground_truth.shape

    # --- Tile selection -------------------------------------------------------
    n_al = _round_up(n, 8)
    tn = min(tile_n, n_al)
    # v7x has 2 TensorCores and only shards the "parallel" grid axis: make sure
    # there are >= 2 N tiles whenever there is enough work to split.
    if n_al > 8 and n_al <= tn:
        tn = _round_up(-(-n_al // 2), 8)
    tm = min(tile_m, _round_up(m, 128))      # lane-aligned GT tile (multiple of 128)
    n_pad = _round_up(n, tn)
    m_pad = _round_up(m, tm)
    num_n = n_pad // tn
    num_m = m_pad // tm
    num_lane_groups = tm // 128

    # --- Operand preparation (cheap one-off wrapper-side XLA ops) -------------
    pred_f32 = prediction.astype(jnp.float32)
    gt_f32 = ground_truth.astype(jnp.float32)

    if n_pad != n:
        pred_f32 = jnp.pad(pred_f32, ((0, n_pad - n), (0, 0)))

    # ||g_j||^2 computed once (not num_n times), lane-dense (1, M_pad) f32 with
    # +inf on padded columns: since cross for a zero-padded GT column is exactly
    # 0, the +inf guarantees padding never wins the min (no in-kernel mask).
    g_sq = jnp.sum(gt_f32 * gt_f32, axis=1)
    if m_pad != m:
        gt_f32 = jnp.pad(gt_f32, ((0, m_pad - m), (0, 0)))
        g_sq = jnp.pad(g_sq, (0, m_pad - m), constant_values=jnp.inf)
    g_sq_row = g_sq.reshape(1, m_pad)

    # GT transposed to (D, M_pad): MXU-native (K, N) RHS and a lane-dense VMEM
    # tile; DMA'd in bf16 when the cross matmul runs in bf16.
    mm_dtype = jnp.bfloat16 if use_bf16_matmul else jnp.float32
    gt_t = gt_f32.T.astype(mm_dtype)                                   # (D, M_pad)

    kernel = functools.partial(_hd_loss_kernel, n_true=n, tn=tn,
                               num_lane_groups=num_lane_groups)

    # VMEM budget: accounts for lane padding of the small-D tiles and the
    # (tn, tm) matmul-result temporaries; capped at 32 MiB (safe headroom on
    # v7x's 64 MiB VMEM; v5e/v6e have 128 MiB so it is trivially safe there).
    def _lane_bytes(r, c, itemsize):
        return _round_up(r, 8) * _round_up(c, 128) * itemsize
    isz = 2 if use_bf16_matmul else 4
    est = (2 * _lane_bytes(tn, d, 4)             # prediction double buffer (f32)
           + 2 * _lane_bytes(d, tm, isz)         # GT^T double buffer
           + 2 * _lane_bytes(1, tm, 4)           # ||g||^2 row double buffer
           + _lane_bytes(tn, d, isz)             # -2p scratch
           + _lane_bytes(tn, 128, 4)             # folded running-min scratch
           + 3 * _lane_bytes(tn, tm, 4)          # matmul result + temporaries
           + 2 * 8 * 128 * 4)                    # output tile
    vmem_limit = int(min(max(2 * est, 16 * 1024 * 1024), 32 * 1024 * 1024))

    partial_max = pl.pallas_call(
        kernel,
        out_shape=jax.ShapeDtypeStruct((num_n, 8, 128), jnp.float32),
        grid_spec=pltpu.PrefetchScalarGridSpec(
            num_scalar_prefetch=0,
            grid=(num_n, num_m),
            in_specs=[
                pl.BlockSpec((tn, d), lambda i, j: (i, 0)),   # prediction tile (resident over M)
                pl.BlockSpec((d, tm), lambda i, j: (0, j)),   # GT^T tile, MXU-native (K, N)
                pl.BlockSpec((1, tm), lambda i, j: (0, j)),   # ||g||^2 row (+inf padding)
            ],
            out_specs=pl.BlockSpec((1, 8, 128), lambda i, j: (i, 0, 0)),
            scratch_shapes=[
                pltpu.VMEM((tn, d), mm_dtype),        # -2p, computed once per N tile
                pltpu.VMEM((tn, 128), jnp.float32),   # folded running min (8x less RMW)
            ],
        ),
        compiler_params=pltpu.CompilerParams(
            dimension_semantics=("parallel", "arbitrary"),
            vmem_limit_bytes=vmem_limit,
        ),
    )(pred_f32, gt_t, g_sq_row)

    hd_sq = jnp.max(partial_max)                 # max over N tiles (wrapper side)
    return jnp.sqrt(jnp.maximum(hd_sq, 0.0))     # the single deferred sqrt


def _hd_loss_ref(prediction, ground_truth):
    """Pure-JAX reference mirroring torch semantics (sanity check)."""
    diff = prediction[:, None, :] - ground_truth[None, :, :]
    dist_map = jnp.sqrt(jnp.sum(diff * diff, axis=-1))
    return jnp.max(jnp.min(dist_map, axis=1))


if __name__ == "__main__":
    key = jax.random.PRNGKey(0)
    k1, k2, k3, k4 = jax.random.split(key, 4)

    # Small point clouds: 16 prediction points, 8 ground-truth points, dim 32.
    prediction = jax.random.normal(k1, (16, 32), dtype=jnp.float32)
    ground_truth = jax.random.normal(k2, (8, 32), dtype=jnp.float32)
    ref = _hd_loss_ref(prediction, ground_truth)

    loss_bf16 = hd_loss(prediction, ground_truth)                      # default bf16 cross term
    jax.block_until_ready(loss_bf16)
    assert jnp.allclose(loss_bf16, ref, rtol=5e-2, atol=5e-2), (loss_bf16, ref)

    loss_f32 = hd_loss(prediction, ground_truth, use_bf16_matmul=False)
    jax.block_until_ready(loss_f32)
    assert jnp.allclose(loss_f32, ref, rtol=1e-4, atol=1e-4), (loss_f32, ref)

    # Multi-tile case: exercises the M reduction loop, 2 parallel N tiles, the
    # lane-group fold (8 groups) and both padding paths
    # (N=300 -> 2 tiles of 256, M=1500 -> 2 tiles of 1024).
    pred_l = jax.random.normal(k3, (300, 32), dtype=jnp.float32)
    gt_l = jax.random.normal(k4, (1500, 32), dtype=jnp.float32)
    ref_l = _hd_loss_ref(pred_l, gt_l)

    loss_l_bf16 = hd_loss(pred_l, gt_l)
    jax.block_until_ready(loss_l_bf16)
    assert jnp.allclose(loss_l_bf16, ref_l, rtol=5e-2, atol=5e-2), (loss_l_bf16, ref_l)

    loss_l_f32 = hd_loss(pred_l, gt_l, use_bf16_matmul=False)
    jax.block_until_ready(loss_l_f32)
    assert jnp.allclose(loss_l_f32, ref_l, rtol=1e-4, atol=1e-4), (loss_l_f32, ref_l)

    print("KERNEL_OK")
</pallas_src>

<mosaic_0001>
module attributes {stable_mosaic.version = 11 : i64} {
  func.func @_hd_loss_kernel(%arg0: i32, %arg1: i32, %arg2: memref<8x32xf32, #tpu.memory_space<vmem>>, %arg3: memref<32x128xbf16, #tpu.memory_space<vmem>>, %arg4: memref<1x128xf32, #tpu.memory_space<vmem>>, %arg5: memref<1x8x128xf32, #tpu.memory_space<vmem>>, %arg6: memref<8x32xbf16, #tpu.memory_space<vmem>>, %arg7: memref<8x128xf32, #tpu.memory_space<vmem>>) attributes {dimension_semantics = [#tpu.dimension_semantics<parallel>, #tpu.dimension_semantics<arbitrary>], iteration_bounds = array<i64: 2, 1>, scalar_prefetch = 0 : i64, scratch_operands = 2 : i64, tpu.core_type = #tpu.core_type<tc>, window_params = [{transform_indices = @transform_0, window_bounds = array<i64: 8, 32>}, {transform_indices = @transform_1, window_bounds = array<i64: 32, 128>}, {transform_indices = @transform_2, window_bounds = array<i64: 1, 128>}, {transform_indices = @transform_3, window_bounds = array<i64: 1, 8, 128>}]} {
    %c0_i32 = arith.constant 0 : i32
    %0 = arith.cmpi eq, %arg1, %c0_i32 : i32
    %1 = arith.extui %0 : i1 to i32
    %c0_i32_0 = arith.constant 0 : i32
    %2 = arith.cmpi ne, %1, %c0_i32_0 : i32
    scf.if %2 {
      %c0_12 = arith.constant 0 : index
      %c0_13 = arith.constant 0 : index
      %18 = vector.load %arg2[%c0_12, %c0_13] : memref<8x32xf32, #tpu.memory_space<vmem>>, vector<8x32xf32>
      %cst_14 = arith.constant -2.000000e+00 : f32
      %19 = vector.broadcast %cst_14 : f32 to vector<8x32xf32>
      %20 = arith.mulf %18, %19 : vector<8x32xf32>
      %21 = arith.truncf %20 : vector<8x32xf32> to vector<8x32xbf16>
      %c0_15 = arith.constant 0 : index
      %c0_16 = arith.constant 0 : index
      %22 = vector.load %arg6[%c0_15, %c0_16] : memref<8x32xbf16, #tpu.memory_space<vmem>>, vector<8x32xbf16>
      tpu.vector_store %arg6[%c0_15, %c0_16], %21 {strides = array<i32>} : memref<8x32xbf16, #tpu.memory_space<vmem>>, vector<8x32xbf16>,
    } else {
    }
    %c0 = arith.constant 0 : index
    %c0_1 = arith.constant 0 : index
    %3 = vector.load %arg6[%c0, %c0_1] : memref<8x32xbf16, #tpu.memory_space<vmem>>, vector<8x32xbf16>
    %c0_2 = arith.constant 0 : index
    %c0_3 = arith.constant 0 : index
    %4 = vector.load %arg3[%c0_2, %c0_3] : memref<32x128xbf16, #tpu.memory_space<vmem>>, vector<32x128xbf16>
    %cst = arith.constant dense<0.000000e+00> : vector<8x128xf32>
    %5 = tpu.matmul %3, %4, %cst {dimension_numbers = #tpu.dot_dimension_numbers<[1], [0], [0], [1], [0, 0, 1, 1], [], []>} : vector<8x32xbf16>, vector<32x128xbf16>, vector<8x128xf32> -> vector<8x128xf32>
    %c0_4 = arith.constant 0 : index
    %c0_5 = arith.constant 0 : index
    %6 = vector.load %arg4[%c0_4, %c0_5] : memref<1x128xf32, #tpu.memory_space<vmem>>, vector<1x128xf32>
    %7 = vector.broadcast %6 : vector<1x128xf32> to vector<8x128xf32>
    %8 = arith.addf %5, %7 : vector<8x128xf32>
    %c0_i32_6 = arith.constant 0 : i32
    %9 = arith.cmpi eq, %arg1, %c0_i32_6 : i32
    %10 = arith.extui %9 : i1 to i32
    %c0_i32_7 = arith.constant 0 : i32
    %11 = arith.cmpi ne, %10, %c0_i32_7 : i32
    scf.if %11 {
      %c0_12 = arith.constant 0 : index
      %c0_13 = arith.constant 0 : index
      %18 = vector.load %arg7[%c0_12, %c0_13] : memref<8x128xf32, #tpu.memory_space<vmem>>, vector<8x128xf32>
      tpu.vector_store %arg7[%c0_12, %c0_13], %8 {strides = array<i32>} : memref<8x128xf32, #tpu.memory_space<vmem>>, vector<8x128xf32>,
    } else {
    }
    %c0_i32_8 = arith.constant 0 : i32
    %12 = arith.cmpi sgt, %arg1, %c0_i32_8 : i32
    %13 = arith.extui %12 : i1 to i32
    %c0_i32_9 = arith.constant 0 : i32
    %14 = arith.cmpi ne, %13, %c0_i32_9 : i32
    scf.if %14 {
      %c0_12 = arith.constant 0 : index
      %c0_13 = arith.constant 0 : index
      %18 = vector.load %arg7[%c0_12, %c0_13] : memref<8x128xf32, #tpu.memory_space<vmem>>, vector<8x128xf32>
      %19 = arith.minimumf %18, %8 : vector<8x128xf32>
      %c0_14 = arith.constant 0 : index
      %c0_15 = arith.constant 0 : index
      %20 = vector.load %arg7[%c0_14, %c0_15] : memref<8x128xf32, #tpu.memory_space<vmem>>, vector<8x128xf32>
      tpu.vector_store %arg7[%c0_14, %c0_15], %19 {strides = array<i32>} : memref<8x128xf32, #tpu.memory_space<vmem>>, vector<8x128xf32>,
    } else {
    }
    %c0_i32_10 = arith.constant 0 : i32
    %15 = arith.cmpi eq, %arg1, %c0_i32_10 : i32
    %16 = arith.extui %15 : i1 to i32
    %c0_i32_11 = arith.constant 0 : i32
    %17 = arith.cmpi ne, %16, %c0_i32_11 : i32
    scf.if %17 {
      %c0_12 = arith.constant 0 : index
      %c0_13 = arith.constant 0 : index
      %18 = vector.load %arg7[%c0_12, %c0_13] : memref<8x128xf32, #tpu.memory_space<vmem>>, vector<8x128xf32>
      %cst_14 = arith.constant dense<0x7F800000> : vector<8xf32>
      %19 = vector.multi_reduction <minimumf>, %18, %cst_14 [1] : vector<8x128xf32> to vector<8xf32>
      %20 = vector.shape_cast %19 : vector<8xf32> to vector<8x1xf32>
      %c0_15 = arith.constant 0 : index
      %c0_16 = arith.constant 0 : index
      %21 = vector.load %arg2[%c0_15, %c0_16] : memref<8x32xf32, #tpu.memory_space<vmem>>, vector<8x32xf32>
      %22 = arith.mulf %21, %21 : vector<8x32xf32>
      %cst_17 = arith.constant dense<0.000000e+00> : vector<8xf32>
      %23 = vector.multi_reduction <add>, %22, %cst_17 [1] : vector<8x32xf32> to vector<8xf32>
      %24 = vector.shape_cast %23 : vector<8xf32> to vector<8x1xf32>
      %25 = arith.addf %20, %24 : vector<8x1xf32>
      %cst_18 = arith.constant 0.000000e+00 : f32
      %26 = vector.broadcast %cst_18 : f32 to vector<8x1xf32>
      %27 = arith.maximumf %25, %26 : vector<8x1xf32>
      %28 = vector.shape_cast %27 : vector<8x1xf32> to vector<1x8x1xf32>
      %cst_19 = arith.constant dense<0xFF800000> : vector<1xf32>
      %29 = vector.multi_reduction <maximumf>, %28, %cst_19 [1, 2] : vector<1x8x1xf32> to vector<1xf32>
      %30 = vector.shape_cast %29 : vector<1xf32> to vector<1x1x1xf32>
      %31 = vector.extract %30[0, 0, 0] : f32 from vector<1x1x1xf32>
      %32 = vector.broadcast %31 : f32 to vector<1x8x128xf32>
      %c0_20 = arith.constant 0 : index
      %c0_21 = arith.constant 0 : index
      %c0_22 = arith.constant 0 : index
      %33 = vector.load %arg5[%c0_20, %c0_21, %c0_22] : memref<1x8x128xf32, #tpu.memory_space<vmem>>, vector<1x8x128xf32>
      tpu.vector_store %arg5[%c0_20, %c0_21, %c0_22], %32 {strides = array<i32>} : memref<1x8x128xf32, #tpu.memory_space<vmem>>, vector<1x8x128xf32>,
    } else {
    }
    return
  }
  func.func @transform_0(%arg0: i32, %arg1: i32) -> (i32, i32) {
    %c0_i32 = arith.constant 0 : i32
    %c0_i32_0 = arith.constant 0 : i32
    return %arg0, %c0_i32 : i32, i32
  }
  func.func @transform_1(%arg0: i32, %arg1: i32) -> (i32, i32) {
    %c0_i32 = arith.constant 0 : i32
    %c0_i32_0 = arith.constant 0 : i32
    return %c0_i32, %arg1 : i32, i32
  }
  func.func @transform_2(%arg0: i32, %arg1: i32) -> (i32, i32) {
    %c0_i32 = arith.constant 0 : i32
    %c0_i32_0 = arith.constant 0 : i32
    return %c0_i32, %arg1 : i32, i32
  }
  func.func @transform_3(%arg0: i32, %arg1: i32) -> (i32, i32, i32) {
    %c0_i32 = arith.constant 0 : i32
    %c0_i32_0 = arith.constant 0 : i32
    %c0_i32_1 = arith.constant 0 : i32
    return %arg0, %c0_i32, %c0_i32_0 : i32, i32, i32
  }
}

</mosaic_0001>

<bundles_post_ra>
// kernel: tpu_custom_call.1
= control target key start
LH: loop header
LB: loop body
LE: loop exit
PB: predicated region body
PF: predicated region fallthrough
CT: control target
= control target key end

     0   :  { %8 = vsyncpa [#allocation5], 0  ;;  %s967_s0 = inlined_call_operand.hbm [shape: f32[16,32], index: 0, kind: input, shape index: {}]   ;;  %s968_s1 = inlined_call_operand.hbm [shape: bf16[32,128], index: 1, kind: input, shape index: {}]   ;;  %s969_s2 = inlined_call_operand.vmem [shape: f32[1,128], index: 2, kind: input, shape index: {}]   ;;  %s970_s3 = inlined_call_operand.hbm [shape: f32[2,8,128], index: 3, kind: output, shape index: {}]  }
   0x1   :  { %10 = vsyncpa [#allocation5 + $0x1], 0 }
   0x2   :  { %11 = vsyncpa [#allocation8], 0 }
   0x3   :  { %12 = vsyncpa [#allocation6], 0 }
   0x4   :  { %14 = vsyncpa [#allocation6 + $0x1], 0  ;;  %s746_s12 = smov 0   ;;  %s748_s13 = smov 0  }
   0x5   :  { %s750_s14 = smov 0   ;;  %s752_s15 = smov 0  }
   0x6   :  { %s754_s16 = smov 0   ;;  %s756_s17 = smov 0  }
   0x7 LB: > { %s461_s18 = sadd.s32 4294967295, %s717_s17   ;;  %s462_s19 = sadd.s32 4294967294, %s717_s17   ;;  %s717_s17 = sphi %s756_s17, %s20_s17   ;;  %s713_s16 = sphi %s754_s16, %s994_s16   ;;  %s709_s15 = sphi %s752_s15, %s993_s15   ;;  %s705_s14 = sphi %s750_s14, %s992_s14   ;;  %s701_s13 = sphi %s748_s13, %s991_s13   ;;  %s697_s12 = sphi %s746_s12, %s990_s12  }
   0x8   : > { %p52_p0 = scmp.ne.s32.totalorder %s701_s13, %s697_s12  ;;  %p780_p1 = scmp.eq.s32.totalorder %s461_s18, 0 }
   0x9   : > { %p784_p2 = scmp.eq.s32.totalorder %s461_s18, 1  ;;  %p134_p3 = scmp.eq.s32.totalorder %s462_s19, 1 }
   0xa   : > { %s975_s20 = scalar_select %p780_p1, 1, 0 }
   0xb   : > { %s976_s21 = scalar_select %p784_p2, 1, 0 }
   0xc   : > { %p790_p4 = por %p780_p1, %p52_p0  ;;  %p463_p5 = scmp.ge.s32.totalorder %s717_s17, 1 }
   0xd   : > { %p795_p6 = por %p134_p3, %p52_p0  ;;  %p141_p7 = scmp.lt.s32.totalorder %s717_s17, 3 }
   0xe   : > { %s977_s22 = scalar_select %p790_p4, 1, 0 }
   0xf   : > { %s978_s23 = scalar_select %p795_p6, 1, 0 }
  0x10   : > { %p800_p8 = pnand %p463_p5, %p141_p7  ;;  %s719_s25 = smov [#allocation7]  }
  0x11   : > { %s155_s26 = sshll.u32 %s719_s25, 4  ;;  %s32_s28 = sadd.s32 1, %s713_s16  ;;  %s156_s26 = int_to_ptr.vmem [resolvable:$true] %s155_s26 }
  0x12   : > { %s979_s24 = scalar_select %p800_p8, 1, 0 }
  0x13   : > { %p502_p9 = pneg %p800_p8  ;;  %s573_s4 = scalar_lea.hbm %s968_s1, 256 }
  0x14   : > { %p574_p12 = scmp.ne.s32.totalorder %s968_s1, %s573_s4  ;;  %p580_p5 = scmp.lt.u32.totalorder %s573_s4, %s968_s1 }
  0x15   : > { %p809_p11 = pnand %p502_p9, %p780_p1 }
  0x17   : > { %p575_p13 = pneg %p809_p11 }
  0x19   : > { %p576_p0 = pnand %p575_p13, %p574_p12 }
  0x1b   : > { %p577_p3 = pneg %p576_p0 }
  0x1d   : > { %p582_p7 = pnand %p580_p5, %p577_p3 }
  0x1f   : > { %585 = shalt.err (!%p582_p7)
}
  0x20   : > { %s586_s9 = scalar_lea.vmem %s156_s26, 256  ;;  %p594_p1 = scmp.lt.s32.totalorder %s156_s26, %s156_s26 }
  0x21   : > { %p587_p9 = scmp.ne.s32.totalorder %s156_s26, %s586_s9  ;;  %p595_p4 = scmp.lt.s32.totalorder %s586_s9, %s586_s9 }
  0x23   : > { %p589_p10 = pnand %p587_p9, %p575_p13  ;;  %p596_p8 = por %p595_p4, %p594_p1 }
  0x25   : > { %p590_p6 = pneg %p589_p10 }
  0x27   : > { %p597_p2 = pnand %p596_p8, %p590_p6 }
  0x29   : > { %600 = shalt.err (!%p597_p2)
}
  0x2a   : > { %s720_s10 = smov 64   ;;  %s721_s11 = smov 4  }
  0x2b   : > { %505 = dma.hbm_to_vmem [thread:$0]  (!%p809_p11), %s968_s1, 256, %s156_s26, [#allocation8], %s720_s10, %s720_s10, %s721_s11  }
  0x2c   : > { %p34_p1 = scmp.ge.s32.totalorder %s32_s28, 2  ;;  %s39_s25 = sadd.s32 1, %s705_s14 }
  0x2d   : > { %p46_p2 = scmp.ne.s32.totalorder %s705_s14, %s701_s13  ;;  %p47_p4 = scmp.eq.s32.totalorder %s717_s17, 0 }
  0x2e   : > { %s996_s28 = smov (%p34_p1, %s32_s28), 0  ;;  %p982_p8 = scmp.ne.s32.totalorder %s976_s21, 0 }
  0x2f   : > { %p836_p6 = por %p47_p4, %p46_p2  ;;  %s36_s27 = ssub.s32 %s713_s16, %s996_s28 }
  0x30   : > { %p842_p10 = por %p982_p8, %p46_p2  ;;  %p515_p12 = scmp.lt.s32.totalorder %s717_s17, 2 }
  0x31   : > { %p37_p11 = scmp.eq.s32.totalorder %s36_s27, 0  ;;  %s175_s26 = sand.u32 1, %s705_s14  }
  0x32   : > { %s467_s4 = sshll.u32 %s175_s26, 3  ;;  %s468_s6 = sshll.u32 %s713_s16, 7 }
  0x33   : > { %s851_s5 = scalar_select %p37_p11, %s705_s14, %s39_s25  }
  0x34   : > { %s857_s9 = scalar_lea.hbm %s967_s0, %s468_s6  ;;  %s179_s21 = scalar_lea.vmem [#allocation4], %s467_s4 }
  0x35   : > { %s186_s10 = sshll.u32 %s179_s21, 4  ;;  %p863_p13 = pnand %p515_p12, %p836_p6  ;;  %s859_s10 = int_to_ptr.vmem [resolvable:$true] %s186_s10 }
  0x36   : > { %s176_s18 = scalar_lea.sflag [#allocation5], %s175_s26  ;;  %s601_s19 = scalar_lea.hbm %s857_s9, 128 }
  0x37   : > { %p602_p0 = scmp.ne.s32.totalorder %s857_s9, %s601_s19  ;;  %p603_p3 = pneg %p863_p13 }
  0x38   : > { %s606_s4 = scalar_lea.hbm %s967_s0, 256  ;;  %p607_p9 = scmp.lt.u32.totalorder %s857_s9, %s967_s0 }
  0x39   : > { %p604_p5 = pnand %p603_p3, %p602_p0  ;;  %p608_p1 = scmp.lt.u32.totalorder %s606_s4, %s601_s19 }
  0x3a   : > { %p610_p4 = scmp.lt.u32.totalorder %s601_s19, %s857_s9 }
  0x3b   : > { %p605_p7 = pneg %p604_p5  ;;  %p609_p2 = por %p608_p1, %p607_p9 }
  0x3d   : > { %p611_p6 = por %p610_p4, %p609_p2 }
  0x3f   : > { %p612_p8 = pnand %p611_p6, %p605_p7 }
  0x41   : > { %615 = shalt.err (!%p612_p8)
}
  0x42   : > { %s616_s26 = scalar_lea.vmem %s859_s10, 128  ;;  %s722_s7 = smov [#allocation4]  }
  0x43   : > { %p617_p12 = scmp.ne.s32.totalorder %s859_s10, %s616_s26  ;;  %s621_s8 = sshll.u32 %s722_s7, 4  ;;  %s622_s8 = int_to_ptr.vmem [resolvable:$false] %s621_s8 }
  0x44   : > { %s623_s21 = scalar_lea.vmem %s622_s8, 256  ;;  %p624_p5 = scmp.lt.s32.totalorder %s859_s10, %s622_s8 }
  0x45   : > { %p619_p11 = pnand %p617_p12, %p603_p3  ;;  %p625_p9 = scmp.lt.s32.totalorder %s623_s21, %s616_s26 }
  0x47   : > { %p620_p0 = pneg %p619_p11  ;;  %p626_p1 = por %p625_p9, %p624_p5 }
  0x49   : > { %p627_p2 = pnand %p626_p1, %p620_p0 }
  0x4b   : > { %630 = shalt.err (!%p627_p2)
}
  0x4c   : > { %509 = dma.hbm_to_vmem [thread:$0]  (!%p863_p13), %s857_s9, 128, %s859_s10, %s176_s18  }
  0x4d   : > { %p985_p7 = scmp.ne.s32.totalorder %s979_s24, 0 }
  0x4e   : > { %s895_s19 = sand.u32 (!%p985_p7), 1, %s701_s13   ;;  %p986_p3 = scmp.ne.s32.totalorder (!%p985_p7), %s977_s22, 0 }
  0x4f   : > { %195 = sbr.rel (%p985_p7) target bundleno = 544 (0x220), region = 32  ;;  %s470_s25 = sshll.u32 (!%p985_p7), %s895_s19, 3 }
  0x50   : > { %s198_s27 = scalar_lea.sflag (!%p985_p7), [#allocation5], %s895_s19  ;;  %s201_s4 = scalar_lea.vmem (!%p985_p7), [#allocation4], %s470_s25 }
  0x56   : > { %684 = dma.done.wait (%p986_p3), %s198_s27, 128  }
  0x57   : > { %686 = vsyncadd (%p986_p3), %s198_s27, 4294967168  ;;  %p987_p13 = scmp.ne.s32.totalorder %s975_s20, 0 }
  0x59   : > { %688 = dma.done.wait (%p987_p13), [#allocation8], 256  }
  0x5a   : > { %690 = vsyncadd (%p987_p13), [#allocation8], 4294967040  ;;  %v723_v0 = vmov 0.0   ;;  %vm724_vm0 = vmmov 0   ;;  %v239_v1 = vld [vmem:[%s201_s4] sm:$0xff]  ;;  %v571_v3 = vld [vmem:[#allocation7] sm:$0xff]  }
  0x5b   : > { %484 = vmatprep.subr.bf16.mxu0 %v723_v0  ;;  %488 = vmatprep.mubr.msk.bf16.mxu0 %vm724_vm0, %v723_v0  ;;  %v240_v2 = vmul.f32 -2.0, %v239_v1  ;;  %vm242_vm1 = vcmask 257024   ;;  %v572_v5 = vld [vmem:[#allocation7 + $0x8] sm:$0xff]   ;;  %vm268_vm2 = vcmask 261120   ;;  %v330_v9 = vmul.f32 %v239_v1, %v239_v1  ;;  %s230_s24 = scalar_lea.vmem [#allocation9], %s470_s25  ;;  %s478_s10 = sshll.u32 %s709_s15, 7 }
  0x5c   : > { %485 = vmatpush3.bf16.msra.mxu0 %v571_v3  ;;  %v473_v7 = vld [vmem:[%s969_s2] ss:$0 sm:$0xff]  ;;  %s359_s9 = sshll.u32 %s230_s24, 4  ;;  %s920_s6 = scalar_lea.hbm %s970_s3, %s478_s10  ;;  %s915_s9 = int_to_ptr.vmem [resolvable:$true] %s359_s9 }
  0x5d   : > { %v241_v4 = vpack.c.bf16 %v240_v2, %v240_v2  ;;  %486 = vmatprep.subr.bf16.mxu0 %v723_v0  ;;  %v331_v14 = vsel %vm268_vm2, %v330_v9, 0.0  ;;  %s346_s26 = scalar_lea.sflag [#allocation6], %s895_s19  ;;  %s631_s7 = scalar_lea.vmem %s915_s9, 128 }
  0x5e   : > { %p632_p4 = scmp.ne.s32.totalorder %s915_s9, %s631_s7  ;;  %s725_s15 = smov [#allocation9]  }
  0x5f   : > { %243 = vst.msk [vmem:[#allocation2] sm:$0xf] %vm242_vm1, %v241_v4  ;;  %s635_s8 = sshll.u32 %s725_s15, 4  ;;  %s636_s8 = int_to_ptr.vmem [resolvable:$false] %s635_s8 }
  0x60   : > { %487 = vmatpush3.bf16.msra.mxu0 %v572_v5  ;;  %p633_p6 = pnand %p632_p4, %p842_p10  ;;  %s637_s21 = scalar_lea.vmem %s636_s8, 256 }
  0x61   : > { %p638_p12 = scmp.lt.s32.totalorder %s915_s9, %s636_s8  ;;  %p639_p11 = scmp.lt.s32.totalorder %s637_s21, %s631_s7 }
  0x62   : > { %p634_p8 = pneg %p633_p6 }
  0x63   : > { %p640_p0 = por %p639_p11, %p638_p12 }
  0x65   : > { %p641_p5 = pnand %p640_p0, %p634_p8 }
  0x66   : > { %v244_v6 = vld [vmem:[#allocation2] sm:$0xf] }
  0x67   : > { %489 = vmatmul.mubr.msk.bf16.vlgmr.msra.gmra.mrb[0].mxu0 %vm268_vm2, %v244_v6 }
 0x13a   : > { %v306_v8 = vpop.f32.mrb[0].mxu0 }
 0x13b   : > { %v490_v10 = vpop.f32.mrb[1].mxu0  ;;  %v307_v11 = vadd.f32 %v473_v7, %v306_v8 }
 0x13c   : > { %v309_v12 = vpop.f32.mrb[2].mxu0 }
 0x13d   : > { %327 = vmin.xlane.f32.xlu0 %v307_v11  ;;  %v491_v13 = vpop.f32.mrb[3].mxu0 }
 0x141   : > { %332 = vadd.xlane.f32.xlu0 %v331_v14 }
 0x1ca   : > { %v328_v15 = vpop.xlane.xlu0 %327 }
 0x1ce   : > { %v333_v16 = vpop.xlane.xlu0 %332 }
 0x1cf   : > { %v334_v17 = vadd.f32 %v333_v16, %v328_v15 }
 0x1d1   : > { %v335_v18 = vmax.f32 %v334_v17, 0.0 }
 0x1d3   : > { %v336_v19 = vrot.slane %v335_v18, 4 }
 0x1d5   : > { %v337_v20 = vmax.f32 %v335_v18, %v336_v19 }
 0x1d7   : > { %v338_v21 = vrot.slane %v337_v20, 2 }
 0x1d9   : > { %v339_v22 = vmax.f32 %v337_v20, %v338_v21 }
 0x1db   : > { %v340_v23 = vrot.slane %v339_v22, 1 }
 0x1dd   : > { %v341_v24 = vmax.f32 %v339_v22, %v340_v23 }
 0x1df   : > { %492 = vpush %v341_v24 }
 0x210   : > { %s493_s11 = spop %492 }
 0x211   : > { %v343_v25 = vstv %s493_s11 }
 0x212   : > { %344 = vst [vmem:[%s230_s24] sm:$0xff] %v343_v25 }
 0x213   : > { %644 = shalt.err (!%p641_p5)
}
 0x214   : > { %s645_s19 = scalar_lea.hbm %s920_s6, 128  ;;  %s649_s4 = scalar_lea.hbm %s970_s3, 256 }
 0x215   : > { %p646_p9 = scmp.ne.s32.totalorder %s920_s6, %s645_s19  ;;  %p650_p7 = scmp.lt.u32.totalorder %s920_s6, %s970_s3 }
 0x216   : > { %p651_p3 = scmp.lt.u32.totalorder %s649_s4, %s645_s19  ;;  %p653_p4 = scmp.lt.u32.totalorder %s645_s19, %s920_s6 }
 0x217   : > { %p647_p1 = pnand %p646_p9, %p842_p10 }
 0x218   : > { %p652_p13 = por %p651_p3, %p650_p7 }
 0x219   : > { %p648_p2 = pneg %p647_p1 }
 0x21a   : > { %p654_p6 = por %p653_p4, %p652_p13 }
 0x21c   : > { %p655_p8 = pnand %p654_p6, %p648_p2 }
 0x21e   : > { %658 = shalt.err (!%p655_p8)
}
 0x21f   : > { %500 = dma.vmem_to_hbm [thread:$0]  (%p842_p10), %s915_s9, 128, %s920_s6, %s346_s26  }
 0x220 PF: > { %s371_s24 = sand.u32 1, %s697_s12   ;;  %p988_p12 = scmp.ne.s32.totalorder %s978_s23, 0 }
 0x221   : > { %p989_p11 = scmp.ge.s32.totalorder %s717_s17, 2  ;;  %s372_s10 = scalar_lea.sflag [#allocation6], %s371_s24 }
 0x223   : > { %p511_p0 = pnand %p989_p11, %p988_p12 }
 0x225   : > { %692 = dma.done.wait (!%p511_p0), %s372_s10, 128  }
 0x226   : > { %694 = vsyncadd (!%p511_p0), %s372_s10, 4294967168  ;;  %s20_s17 = sadd.s32 1, %s717_s17   ;;  %s990_s12 = smov %s701_s13 }
 0x227   : > { %p17_p5 = scmp.ge.s32.totalorder %s20_s17, 4   ;;  %s991_s13 = smov %s705_s14 }
 0x228   : > { %s992_s14 = smov %s851_s5  ;;  %s993_s15 = smov %s713_s16 }
 0x229   : > { %s994_s16 = smov %s996_s28  ;;  %19 = sbr.rel (!%p17_p5) target bundleno = 7 (0x7), region = 101 }
 0x230   :  { %377 = vsyncpa [#allocation5], 1 }
 0x231   :  { %379 = vsyncpa [#allocation5 + $0x1], 1 }
 0x232   :  { %380 = vsyncpa [#allocation8], 1 }
 0x233   :  { %381 = vsyncpa [#allocation6], 1 }
 0x234   :  { %383 = vsyncpa [#allocation6 + $0x1], 1 }

</bundles_post_ra>
